<compile_context>
chip_gen: v7x
topology: tpu7x:2x2x1
jax: 0.10.0
libtpu: 0.0.40
codegen_flags: <defaults>
</compile_context>

<pallas_src>
import jax
import jax.numpy as jnp
from jax.experimental import pallas as pl
from jax.experimental.pallas import tpu as pltpu

_MIB = 1 << 20
# Resident-weight budget: conservative for the tightest generation (v7x:
# 64 MiB physical / 32 MiB scoped VMEM), leaving room for double-buffered
# activation / output tiles.
_RESIDENT_VMEM_BUDGET = 24 * _MIB


def _round_up(n, m):
    return ((n + m - 1) // m) * m


def _sublane_align(dtype):
    # f32 packs 8 rows per sublane group, bf16 packs 16, 1-byte types pack 32.
    return max(8, 32 // jnp.dtype(dtype).itemsize)


def _pick_tile(n, cap, align):
    """Largest tile <= cap that divides n and is a multiple of align (n % align == 0)."""
    if n <= cap:
        return n
    for t in range(cap - cap % align, 0, -align):
        if n % t == 0:
            return t
    return align


# ---------------------------------------------------------------------------
# Kernels
# ---------------------------------------------------------------------------
def _mlp_resident_kernel(x_ref, w_ref, b_ref, o_ref):
    # x_ref: (TB, Hp) streamed activations; w_ref: (Hp, Hp) VMEM-resident weight;
    # b_ref: (1, Hp) f32 bias (resident); o_ref: (TB, Hp).
    # Cast the activation tile in VMEM (cheaper than a wrapper-side XLA cast
    # that writes a low-precision copy back to HBM).
    x = x_ref[...].astype(w_ref.dtype)
    y = jnp.dot(x, w_ref[...], preferred_element_type=jnp.float32)
    o_ref[...] = jnp.maximum(y + b_ref[...], 0.0).astype(o_ref.dtype)


def _mlp_tiled_kernel(x_ref, w_ref, b_ref, o_ref, acc_ref):
    # Fallback (B, N, K)-tiled path for very large hidden sizes.
    @pl.when(pl.program_id(2) == 0)
    def _init():
        acc_ref[...] = jnp.zeros_like(acc_ref)

    acc_ref[...] += jnp.dot(
        x_ref[...].astype(w_ref.dtype), w_ref[...],
        preferred_element_type=jnp.float32,
    )

    @pl.when(pl.program_id(2) == pl.num_programs(2) - 1)
    def _finalize():
        o_ref[...] = jnp.maximum(acc_ref[...] + b_ref[...], 0.0).astype(o_ref.dtype)


# ---------------------------------------------------------------------------
# Parameter prep (one-time, at load) + forward wrapper
# ---------------------------------------------------------------------------
def mlp_prepare_params(weight, bias, *, param_dtype=jnp.float32):
    """One-time parameter prep (transpose + lane-pad); do NOT call per forward.

    weight: [H_out, H_in] (PyTorch nn.Linear layout), bias: [H_out].
    Returns (w_t_pad [Hp, Hp], b_pad [1, Hp]) with Hp = round_up(H, 128).
    Zero padding keeps the valid output region exact.
    param_dtype=jnp.bfloat16 halves the dominant weight-DMA stream (recommended
    for inference on v6e/v7x; MXU still accumulates in f32).
    """
    H_out, H_in = weight.shape
    Hp = _round_up(max(H_in, H_out), 128)
    w_t = jnp.asarray(weight).T.astype(param_dtype)          # transpose ONCE
    w_t = jnp.pad(w_t, ((0, Hp - H_in), (0, Hp - H_out)))
    b = jnp.pad(jnp.asarray(bias, jnp.float32), (0, Hp - H_out)).reshape(1, Hp)
    return w_t, b


def mlp_forward(x, w_t_pad, b_pad):
    """Fused Linear + ReLU:  relu(x @ w_t + b).

    x        : [B, H]  activations (any float dtype)
    w_t_pad  : [Hp, Hp] pre-transposed, lane-padded weight (mlp_prepare_params)
    b_pad    : [1, Hp]  lane-padded f32 bias
    Returns  : [B, H] in x.dtype.
    """
    B, H = x.shape
    Hp = w_t_pad.shape[0]
    assert w_t_pad.shape == (Hp, Hp) and b_pad.shape == (1, Hp) and H <= Hp

    x_itemsize = jnp.dtype(x.dtype).itemsize
    w_itemsize = jnp.dtype(w_t_pad.dtype).itemsize
    w_bytes = Hp * Hp * w_itemsize
    b_bytes = Hp * 4
    sub = _sublane_align(w_t_pad.dtype)

    # Resident-weight path whenever the whole weight + double-buffered x/out
    # tiles fit the conservative cross-generation VMEM budget.
    resident_need_bound = w_bytes + b_bytes + 2 * 256 * Hp * 2 * x_itemsize
    use_resident = resident_need_bound <= _RESIDENT_VMEM_BUDGET

    # Batch tile: capped (so the batch grid axis can shard across v7x's two
    # TensorCores once B is big enough) and Bp padded up to a multiple of the
    # tile so tiling never collapses to tiny tiles.
    tile_b = min(256 if use_resident else 512, _round_up(B, sub))
    Bp = _round_up(B, tile_b)

    x_pad = x
    if (Bp != B) or (Hp != H):
        x_pad = jnp.pad(x, ((0, Bp - B), (0, Hp - H)))
    # NOTE: no wrapper-side dtype cast -- the kernel casts the x tile in VMEM.

    cost = pl.CostEstimate(
        flops=2 * Bp * Hp * Hp,
        transcendentals=0,
        bytes_accessed=Bp * Hp * 2 * x_itemsize + w_bytes + b_bytes,
    )

    if use_resident:
        need = w_bytes + b_bytes + 2 * tile_b * Hp * 2 * x_itemsize
        vmem_limit = int(min(64 * _MIB, max(32 * _MIB, need + 4 * _MIB)))
        out = pl.pallas_call(
            _mlp_resident_kernel,
            out_shape=jax.ShapeDtypeStruct((Bp, Hp), x.dtype),
            grid_spec=pltpu.PrefetchScalarGridSpec(
                num_scalar_prefetch=0,
                grid=(Bp // tile_b,),
                in_specs=[
                    pl.BlockSpec((tile_b, Hp), lambda i: (i, 0)),   # x (streamed)
                    pl.BlockSpec((Hp, Hp), lambda i: (0, 0)),       # weight (resident)
                    pl.BlockSpec((1, Hp), lambda i: (0, 0)),        # bias (resident)
                ],
                out_specs=pl.BlockSpec((tile_b, Hp), lambda i: (i, 0)),
            ),
            compiler_params=pltpu.CompilerParams(
                dimension_semantics=("parallel",),
                vmem_limit_bytes=vmem_limit,
            ),
            cost_estimate=cost,
        )(x_pad, w_t_pad, b_pad)
    else:
        # Large-H fallback: (B, N, K) tiled accumulator pipeline.
        tile_n = _pick_tile(Hp, 1024, 128)
        tile_k = _pick_tile(Hp, 1024, 128)
        need = (2 * (tile_b * tile_k * x_itemsize
                     + tile_k * tile_n * w_itemsize
                     + tile_n * 4
                     + tile_b * tile_n * x_itemsize)
                + tile_b * tile_n * 4)
        vmem_limit = int(min(48 * _MIB, max(32 * _MIB, need + 4 * _MIB)))
        grid = (Bp // tile_b, Hp // tile_n, Hp // tile_k)
        out = pl.pallas_call(
            _mlp_tiled_kernel,
            out_shape=jax.ShapeDtypeStruct((Bp, Hp), x.dtype),
            grid_spec=pltpu.PrefetchScalarGridSpec(
                num_scalar_prefetch=0,
                grid=grid,
                in_specs=[
                    pl.BlockSpec((tile_b, tile_k), lambda i, j, k: (i, k)),   # x tile
                    pl.BlockSpec((tile_k, tile_n), lambda i, j, k: (k, j)),   # weight tile
                    pl.BlockSpec((1, tile_n), lambda i, j, k: (0, j)),        # bias tile
                ],
                out_specs=pl.BlockSpec((tile_b, tile_n), lambda i, j, k: (i, j)),
                scratch_shapes=[pltpu.VMEM((tile_b, tile_n), jnp.float32)],
            ),
            compiler_params=pltpu.CompilerParams(
                dimension_semantics=("parallel", "parallel", "arbitrary"),
                vmem_limit_bytes=vmem_limit,
            ),
            cost_estimate=cost,
        )(x_pad, w_t_pad, b_pad)

    if (Bp != B) or (Hp != H):
        out = out[:B, :H]
    return out


def mlp_reference(x, weight, bias):
    return jnp.maximum(x @ weight.T + bias, 0.0)


if __name__ == "__main__":
    # arg.GRU_hidden -> hidden size of the Linear layer
    GRU_HIDDEN = 32
    BATCH = 8

    key = jax.random.PRNGKey(0)
    kx, kw, kb = jax.random.split(key, 3)

    x = jax.random.normal(kx, (BATCH, GRU_HIDDEN), dtype=jnp.float32)
    # Deterministic parameter init (shapes match nn.Linear(GRU_hidden, GRU_hidden))
    bound = 1.0 / (GRU_HIDDEN ** 0.5)
    weight = jax.random.uniform(kw, (GRU_HIDDEN, GRU_HIDDEN),
                                minval=-bound, maxval=bound, dtype=jnp.float32)
    bias = jax.random.uniform(kb, (GRU_HIDDEN,),
                              minval=-bound, maxval=bound, dtype=jnp.float32)

    # --- f32 weight path: exact vs. reference --------------------------------
    w_t_pad, b_pad = mlp_prepare_params(weight, bias, param_dtype=jnp.float32)
    out = jax.block_until_ready(mlp_forward(x, w_t_pad, b_pad))
    ref = mlp_reference(x, weight, bias)
    assert out.shape == (BATCH, GRU_HIDDEN)
    assert jnp.allclose(out, ref, atol=1e-5, rtol=1e-5), "f32 mismatch vs reference"

    # --- bf16 weight path (halves weight DMA): looser-tolerance sanity check --
    w_t_bf16, b_pad2 = mlp_prepare_params(weight, bias, param_dtype=jnp.bfloat16)
    out_bf16 = jax.block_until_ready(mlp_forward(x, w_t_bf16, b_pad2))
    ref_bf16 = jnp.maximum(
        x.astype(jnp.bfloat16).astype(jnp.float32)
        @ weight.astype(jnp.bfloat16).astype(jnp.float32).T + bias, 0.0)
    assert out_bf16.shape == (BATCH, GRU_HIDDEN)
    assert jnp.allclose(out_bf16, ref_bf16, atol=5e-4, rtol=5e-4), "bf16 mismatch"

    print("KERNEL_OK")
</pallas_src>

<mosaic_0001>
module attributes {stable_mosaic.version = 11 : i64} {
  func.func @_mlp_resident_kernel(%arg0: i32, %arg1: memref<8x128xf32, #tpu.memory_space<vmem>>, %arg2: memref<128x128xf32, #tpu.memory_space<vmem>>, %arg3: memref<1x128xf32, #tpu.memory_space<vmem>>, %arg4: memref<8x128xf32, #tpu.memory_space<vmem>>) attributes {dimension_semantics = [#tpu.dimension_semantics<parallel>], iteration_bounds = array<i64: 1>, scalar_prefetch = 0 : i64, scratch_operands = 0 : i64, tpu.core_type = #tpu.core_type<tc>, window_params = [{transform_indices = @transform_0, window_bounds = array<i64: 8, 128>}, {pipeline_mode = #tpu.pipeline_mode<synchronous>, transform_indices = @transform_1, window_bounds = array<i64: 128, 128>}, {pipeline_mode = #tpu.pipeline_mode<synchronous>, transform_indices = @transform_2, window_bounds = array<i64: 1, 128>}, {transform_indices = @transform_3, window_bounds = array<i64: 8, 128>}]} {
    %c0 = arith.constant 0 : index
    %c0_0 = arith.constant 0 : index
    %0 = vector.load %arg1[%c0, %c0_0] : memref<8x128xf32, #tpu.memory_space<vmem>>, vector<8x128xf32>
    %c0_1 = arith.constant 0 : index
    %c0_2 = arith.constant 0 : index
    %1 = vector.load %arg2[%c0_1, %c0_2] : memref<128x128xf32, #tpu.memory_space<vmem>>, vector<128x128xf32>
    %cst = arith.constant dense<0.000000e+00> : vector<8x128xf32>
    %2 = tpu.matmul %0, %1, %cst {dimension_numbers = #tpu.dot_dimension_numbers<[1], [0], [0], [1], [0, 0, 1, 1], [], []>} : vector<8x128xf32>, vector<128x128xf32>, vector<8x128xf32> -> vector<8x128xf32>
    %c0_3 = arith.constant 0 : index
    %c0_4 = arith.constant 0 : index
    %3 = vector.load %arg3[%c0_3, %c0_4] : memref<1x128xf32, #tpu.memory_space<vmem>>, vector<1x128xf32>
    %4 = vector.broadcast %3 : vector<1x128xf32> to vector<8x128xf32>
    %5 = arith.addf %2, %4 : vector<8x128xf32>
    %cst_5 = arith.constant 0.000000e+00 : f32
    %6 = vector.broadcast %cst_5 : f32 to vector<8x128xf32>
    %7 = arith.maximumf %5, %6 : vector<8x128xf32>
    %c0_6 = arith.constant 0 : index
    %c0_7 = arith.constant 0 : index
    %8 = vector.load %arg4[%c0_6, %c0_7] : memref<8x128xf32, #tpu.memory_space<vmem>>, vector<8x128xf32>
    tpu.vector_store %arg4[%c0_6, %c0_7], %7 {strides = array<i32>} : memref<8x128xf32, #tpu.memory_space<vmem>>, vector<8x128xf32>,
    return
  }
  func.func @transform_0(%arg0: i32) -> (i32, i32) {
    %c0_i32 = arith.constant 0 : i32
    %c0_i32_0 = arith.constant 0 : i32
    return %arg0, %c0_i32 : i32, i32
  }
  func.func @transform_1(%arg0: i32) -> (i32, i32) {
    %c0_i32 = arith.constant 0 : i32
    %c0_i32_0 = arith.constant 0 : i32
    %c0_i32_1 = arith.constant 0 : i32
    return %c0_i32, %c0_i32_0 : i32, i32
  }
  func.func @transform_2(%arg0: i32) -> (i32, i32) {
    %c0_i32 = arith.constant 0 : i32
    %c0_i32_0 = arith.constant 0 : i32
    %c0_i32_1 = arith.constant 0 : i32
    return %c0_i32, %c0_i32_0 : i32, i32
  }
  func.func @transform_3(%arg0: i32) -> (i32, i32) {
    %c0_i32 = arith.constant 0 : i32
    %c0_i32_0 = arith.constant 0 : i32
    return %arg0, %c0_i32 : i32, i32
  }
}

</mosaic_0001>

<bundles_post_ra>
// kernel: tpu_custom_call.1
= control target key start
LH: loop header
LB: loop body
LE: loop exit
PB: predicated region body
PF: predicated region fallthrough
CT: control target
= control target key end

     0   :  { %8 = vsyncpa [#allocation3], 0  ;;  %s384_s0 = inlined_call_operand.hbm [shape: f32[8,128], index: 0, kind: input, shape index: {}]   ;;  %s385_s1 = inlined_call_operand.hbm [shape: f32[128,128], index: 1, kind: input, shape index: {}]   ;;  %s386_s2 = inlined_call_operand.vmem [shape: f32[1,128], index: 2, kind: input, shape index: {}]   ;;  %s387_s3 = inlined_call_operand.hbm [shape: f32[8,128], index: 3, kind: output, shape index: {}]  }
   0x1   :  { %9 = vsyncpa [#allocation6], 0 }
   0x2   :  { %10 = vsyncpa [#allocation4], 0  ;;  %s310_s12 = smov [#allocation2]   ;;  %s311_s14 = smov [#allocation5]  }
   0x3   :  { %s17_s13 = sshll.u32 %s310_s12, 4  ;;  %s26_s15 = sshll.u32 %s311_s14, 4  ;;  %s18_s13 = int_to_ptr.vmem [resolvable:$true] %s17_s13  ;;  %s338_s15 = int_to_ptr.vmem [resolvable:$true] %s26_s15 }
   0x4   :  { %s238_s18 = scalar_lea.hbm %s384_s0, 128 }
   0x5   :  { %p239_p0 = scmp.ne.s32.totalorder %s384_s0, %s238_s18  ;;  %p242_p1 = scmp.lt.u32.totalorder %s238_s18, %s384_s0 }
   0x7   :  { %p244_p2 = pnand %p242_p1, %p239_p0 }
   0x9   :  { %247 = shalt.err (!%p244_p2)
}
   0xa   :  { %s248_s23 = scalar_lea.vmem %s18_s13, 128  ;;  %p253_p4 = scmp.lt.s32.totalorder %s18_s13, %s18_s13 }
   0xb   :  { %p249_p3 = scmp.ne.s32.totalorder %s18_s13, %s248_s23  ;;  %p254_p5 = scmp.lt.s32.totalorder %s248_s23, %s248_s23 }
   0xd   :  { %p255_p6 = por %p254_p5, %p253_p4 }
   0xf   :  { %p256_p7 = pnand %p255_p6, %p249_p3 }
  0x11   :  { %259 = shalt.err (!%p256_p7)
}
  0x12   :  { %20 = dma.hbm_to_vmem [thread:$0]  %s384_s0, 128, %s18_s13, [#allocation3]  }
  0x13   :  { %s260_s28 = scalar_lea.hbm %s385_s1, 2048 }
  0x14   :  { %p261_p8 = scmp.ne.s32.totalorder %s385_s1, %s260_s28  ;;  %p264_p9 = scmp.lt.u32.totalorder %s260_s28, %s385_s1 }
  0x16   :  { %p266_p10 = pnand %p264_p9, %p261_p8 }
  0x18   :  { %269 = shalt.err (!%p266_p10)
}
  0x19   :  { %s270_s6 = scalar_lea.vmem %s338_s15, 2048  ;;  %p275_p12 = scmp.lt.s32.totalorder %s338_s15, %s338_s15 }
  0x1a   :  { %p271_p11 = scmp.ne.s32.totalorder %s338_s15, %s270_s6  ;;  %p276_p13 = scmp.lt.s32.totalorder %s270_s6, %s270_s6 }
  0x1c   :  { %p277_p0 = por %p276_p13, %p275_p12 }
  0x1e   :  { %p278_p1 = pnand %p277_p0, %p271_p11 }
  0x20   :  { %281 = shalt.err (!%p278_p1)
}
  0x21   :  { %s312_s0 = smov 128   ;;  %s313_s7 = smov 8  }
  0x22   :  { %32 = dma.hbm_to_vmem [thread:$0]  %s385_s1, 2048, %s338_s15, [#allocation6], %s312_s0, %s312_s0, %s313_s7  }
  0x23   :  { %304 = dma.done.wait [#allocation3], 128  }
  0x24   :  { %305 = vsyncadd [#allocation3], 4294967168 }
  0x25   :  { %306 = dma.done.wait [#allocation6], 2048  }
  0x26   :  { %307 = vsyncadd [#allocation6], 4294965248  ;;  %v314_v0 = vmov 0.0|0.0   ;;  %vm315_vm0 = vmmov 0   ;;  %v316_v1 = vmov 0.0   ;;  %v42_v2 = vld [vmem:[#allocation5] sm:$0xff] }
  0x27   :  { %206 = vmatprep.subr.bf16.mxu0 %v314_v0  ;;  %203 = vmatprep.mubr.msk.f32.mxu0 %vm315_vm0, %v316_v1  ;;  %v43_v3 = vld [vmem:[#allocation5 + $0x8] sm:$0xff]  ;;  %v44_v4 = vld [vmem:[#allocation5 + $0x10] sm:$0xff]  ;;  %v45_v6 = vld [vmem:[#allocation5 + $0x18] sm:$0xff]  ;;  %s317_s11 = smov [#allocation7]  }
  0x28   :  { %v207_v5 = vpack.c.bf16 %v43_v3, %v42_v2  ;;  %v210_v7 = vpack.c.bf16 %v45_v6, %v44_v4  ;;  %v46_v8 = vld [vmem:[#allocation5 + $0x20] sm:$0xff]  ;;  %v47_v9 = vld [vmem:[#allocation5 + $0x28] sm:$0xff]  ;;  %v48_v11 = vld [vmem:[#allocation5 + $0x30] sm:$0xff]  ;;  %s143_s12 = sshll.u32 %s317_s11, 4  ;;  %s144_s12 = int_to_ptr.vmem [resolvable:$true] %s143_s12 }
  0x29   :  { %v213_v10 = vpack.c.bf16 %v47_v9, %v46_v8  ;;  %v49_v12 = vld [vmem:[#allocation5 + $0x38] sm:$0xff]  ;;  %v50_v14 = vld [vmem:[#allocation5 + $0x40] sm:$0xff]  ;;  %v51_v15 = vld [vmem:[#allocation5 + $0x48] sm:$0xff]  ;;  %s282_s13 = scalar_lea.vmem %s144_s12, 128  ;;  %p287_p3 = scmp.lt.s32.totalorder %s144_s12, %s144_s12 }
  0x2a   :  { %208 = vmatpush3.bf16.msra.mxu0 %v207_v5  ;;  %v216_v13 = vpack.c.bf16 %v49_v12, %v48_v11  ;;  %v219_v16 = vpack.c.bf16 %v51_v15, %v50_v14  ;;  %v52_v17 = vld [vmem:[#allocation5 + $0x50] sm:$0xff]  ;;  %v53_v18 = vld [vmem:[#allocation5 + $0x58] sm:$0xff]  ;;  %v54_v20 = vld [vmem:[#allocation5 + $0x60] sm:$0xff]  ;;  %p283_p2 = scmp.ne.s32.totalorder %s144_s12, %s282_s13  ;;  %p288_p4 = scmp.lt.s32.totalorder %s282_s13, %s282_s13 }
  0x2b   :  { %209 = vmatprep.subr.bf16.mxu0 %v314_v0  ;;  %v222_v19 = vpack.c.bf16 %v53_v18, %v52_v17  ;;  %v55_v21 = vld [vmem:[#allocation5 + $0x68] sm:$0xff]  ;;  %v56_v23 = vld [vmem:[#allocation5 + $0x70] sm:$0xff]  ;;  %v57_v24 = vld [vmem:[#allocation5 + $0x78] sm:$0xff] }
  0x2c   :  { %v225_v22 = vpack.c.bf16 %v55_v21, %v54_v20  ;;  %v228_v25 = vpack.c.bf16 %v57_v24, %v56_v23  ;;  %v41_v26 = vld [vmem:[#allocation2] sm:$0xff]  ;;  %p289_p5 = por %p288_p4, %p287_p3 }
  0x2d   :  { %v153_v27 = vld [vmem:[%s386_s2] ss:$0 sm:$0xff] }
  0x2e   :  { %211 = vmatpush3.bf16.msra.mxu0 %v210_v7  ;;  %p290_p6 = pnand %p289_p5, %p283_p2 }
  0x2f   :  { %212 = vmatprep.subr.bf16.mxu0 %v314_v0 }
  0x32   :  { %214 = vmatpush3.bf16.msra.mxu0 %v213_v10 }
  0x33   :  { %215 = vmatprep.subr.bf16.mxu0 %v314_v0 }
  0x36   :  { %217 = vmatpush3.bf16.msra.mxu0 %v216_v13 }
  0x37   :  { %218 = vmatprep.subr.bf16.mxu0 %v314_v0 }
  0x3a   :  { %220 = vmatpush3.bf16.msra.mxu0 %v219_v16 }
  0x3b   :  { %221 = vmatprep.subr.bf16.mxu0 %v314_v0 }
  0x3e   :  { %223 = vmatpush3.bf16.msra.mxu0 %v222_v19 }
  0x3f   :  { %224 = vmatprep.subr.bf16.mxu0 %v314_v0 }
  0x42   :  { %226 = vmatpush3.bf16.msra.mxu0 %v225_v22 }
  0x43   :  { %227 = vmatprep.subr.bf16.mxu0 %v314_v0 }
  0x46   :  { %229 = vmatpush3.bf16.msra.mxu0 %v228_v25 }
  0x49   :  { %204 = vmatmul.mubr.f32.vlgmr.msra.gmra.mrb[0].mxu0 %v41_v26 }
 0x11c   :  { %v131_v28 = vpop.f32.mrb[0].mxu0 }
 0x11d   :  { %v132_v29 = vadd.f32 %v153_v27, %v131_v28  ;;  %v205_v30 = vpop.f32.mrb[1].mxu0 }
 0x11f   :  { %v135_v31 = vmax.f32 %v132_v29, 0.0 }
 0x121   :  { %136 = vst [vmem:[#allocation7] sm:$0xff] %v135_v31 }
 0x122   :  { %293 = shalt.err (!%p290_p6)
}
 0x123   :  { %s294_s16 = scalar_lea.hbm %s387_s3, 128 }
 0x124   :  { %p295_p7 = scmp.ne.s32.totalorder %s387_s3, %s294_s16  ;;  %p298_p8 = scmp.lt.u32.totalorder %s294_s16, %s387_s3 }
 0x126   :  { %p300_p9 = pnand %p298_p8, %p295_p7 }
 0x128   :  { %303 = shalt.err (!%p300_p9)
}
 0x129   :  { %146 = dma.vmem_to_hbm [thread:$0]  %s144_s12, 128, %s387_s3, [#allocation4]  }
 0x12a   :  { %308 = dma.done.wait [#allocation4], 128  }
 0x12b   :  { %309 = vsyncadd [#allocation4], 4294967168 }
 0x12c   :  { %150 = vsyncpa [#allocation3], 1 }
 0x12d   :  { %151 = vsyncpa [#allocation6], 1 }
 0x12e   :  { %152 = vsyncpa [#allocation4], 1 }

</bundles_post_ra>
